<compile_context>
chip_gen: v7x
topology: tpu7x:2x2x1
jax: 0.10.0
libtpu: 0.0.40
codegen_flags: <defaults>
</compile_context>

<pallas_src>
import jax
import jax.numpy as jnp
from jax import lax
from jax.experimental import pallas as pl
from jax.experimental.pallas import tpu as pltpu


def _make_sppf_kernel(H, W, c_blk):
    HW = H * W

    def kernel(wc_ref, hc_ref, x_ref, o_ref):
        # wc_ref/hc_ref: (1, H*W) int32 -- w / h coordinate of every lane position.
        # x_ref:         (1, c_blk, H*W)      channels on sublanes, spatial on lanes.
        # o_ref:         (1, 4, c_blk, H*W)   slots for [x, o1, o2, o3].
        x = x_ref[0]                                      # (c_blk, HW)
        neg = jnp.asarray(-jnp.inf, dtype=x.dtype)

        # Boundary-validity masks, built ONCE per grid step (JAX does not CSE
        # broadcasts) and reused by all three pools.  Sublane broadcast is cheap.
        wc = jnp.broadcast_to(wc_ref[...], (c_blk, HW))
        hc = jnp.broadcast_to(hc_ref[...], (c_blk, HW))
        w_taps = ((-1, wc >= 1), (-2, wc >= 2), (1, wc <= W - 2), (2, wc <= W - 3))
        h_taps = ((-W, hc >= 1), (-2 * W, hc >= 2), (W, hc <= H - 2), (2 * W, hc <= H - 3))

        def pool5(v, taps):
            # result[p] = max over in-bounds offsets of v[p + off]  ("same" -inf pad).
            # pltpu.roll is circular; the mask replaces wrapped-around values.
            t = [jnp.where(m, pltpu.roll(v, shift=(-off) % HW, axis=1), neg)
                 for off, m in taps]
            # Balanced 2-deep max tree instead of a serial 4-deep chain.
            return jnp.maximum(
                jnp.maximum(jnp.maximum(t[0], t[1]), jnp.maximum(t[2], t[3])), v)

        o_ref[0, 0] = x
        p = x
        for k in range(3):                       # three chained 5x5 / s1 / pad2 max pools
            p = pool5(pool5(p, w_taps), h_taps)  # separable: 5 taps along W, then along H
            o_ref[0, k + 1] = p

    return kernel


def _pick_c_blk(B, C, HW, itemsize, budget_bytes=16 * 1024 * 1024):
    """Largest channel block whose double-buffered in+out blocks
    (~10 * cb * HW * itemsize) fit `budget_bytes`, preferring >=2 total grid
    steps so both TensorCores of a megacore part (v7x) get work."""

    def fits(cb):
        return 10 * cb * HW * itemsize <= budget_bytes

    # Layout-legal block sizes: full C, or a multiple of 8 that divides C.
    cands = [C] + [cb for cb in range(8 * (C // 8), 0, -8) if cb != C and C % cb == 0]
    fitting = [cb for cb in cands if fits(cb)]
    if not fitting:
        return cands[-1]      # smallest legal block; vmem_limit_bytes is raised explicitly
    for cb in fitting:
        if B * (C // cb) >= 2:
            return cb         # largest fitting block that still yields >=2 grid steps
    return fitting[0]         # single-step grid is the only fitting option


def sppf(x):
    """x: (B, C, H, W) float -> (B, 4*C, H, W) == torch.cat([x, o1, o2, o3], dim=1)."""
    B, C, H, W = x.shape
    assert jnp.issubdtype(x.dtype, jnp.floating), "SPPF max-pool uses -inf padding; needs float dtype"
    HW = H * W
    itemsize = jnp.dtype(x.dtype).itemsize
    c_blk = _pick_c_blk(B, C, HW, itemsize)
    grid = (B, C // c_blk)

    # Tiny coordinate rows; same block every grid step, stays resident in VMEM.
    pos = jnp.arange(HW, dtype=jnp.int32)
    wcoord = (pos % W).reshape(1, HW)
    hcoord = (pos // W).reshape(1, HW)

    x_flat = x.reshape(B, C, HW)                 # merges contiguous trailing dims: free

    out = pl.pallas_call(
        _make_sppf_kernel(H, W, c_blk),
        out_shape=jax.ShapeDtypeStruct((B, 4, C, HW), x.dtype),
        grid=grid,
        in_specs=[
            pl.BlockSpec((1, HW), lambda b, c: (0, 0)),
            pl.BlockSpec((1, HW), lambda b, c: (0, 0)),
            pl.BlockSpec((1, c_blk, HW), lambda b, c: (b, c, 0)),
        ],
        out_specs=pl.BlockSpec((1, 4, c_blk, HW), lambda b, c: (b, 0, c, 0)),
        compiler_params=pltpu.CompilerParams(
            dimension_semantics=("parallel", "parallel"),
            vmem_limit_bytes=48 * 1024 * 1024),
        cost_estimate=pl.CostEstimate(
            flops=24 * B * C * HW,
            bytes_accessed=5 * B * C * HW * itemsize,
            transcendentals=0),
    )(wcoord, hcoord, x_flat)

    # (B, 4, C, H*W) -> (B, 4*C, H, W): contiguous-dim merge/split only (free),
    # channel order [x, o1, o2, o3] reproduces torch.cat(..., dim=1).
    return out.reshape(B, 4 * C, H, W)


# ---------------- pure-JAX reference ----------------
def _maxpool5_ref(x):
    # nn.MaxPool2d(5, 1, padding=2) on NCHW (PyTorch pads with -inf for max pool).
    return lax.reduce_window(
        x, -jnp.inf, lax.max,
        window_dimensions=(1, 1, 5, 5),
        window_strides=(1, 1, 1, 1),
        padding=((0, 0), (0, 0), (2, 2), (2, 2)))


def _sppf_ref(x):
    o1 = _maxpool5_ref(x)
    o2 = _maxpool5_ref(o1)
    o3 = _maxpool5_ref(o2)
    return jnp.concatenate([x, o1, o2, o3], axis=1)


if __name__ == "__main__":
    key = jax.random.PRNGKey(0)
    B, C, H, W = 2, 4, 16, 16
    x = jax.random.normal(key, (B, C, H, W), dtype=jnp.float32)

    out = jax.block_until_ready(sppf(x))
    ref = jax.block_until_ready(_sppf_ref(x))

    assert out.shape == (B, 4 * C, H, W), out.shape
    assert jnp.allclose(out, ref, atol=1e-6, rtol=1e-6), "mismatch vs reference"
    print("KERNEL_OK")
</pallas_src>

<mosaic_0001>
module attributes {stable_mosaic.version = 11 : i64} {
  func.func @kernel(%arg0: i32, %arg1: i32, %arg2: memref<1x256xi32, #tpu.memory_space<vmem>>, %arg3: memref<1x256xi32, #tpu.memory_space<vmem>>, %arg4: memref<1x4x256xf32, #tpu.memory_space<vmem>>, %arg5: memref<1x4x4x256xf32, #tpu.memory_space<vmem>>) attributes {dimension_semantics = [#tpu.dimension_semantics<parallel>, #tpu.dimension_semantics<parallel>], iteration_bounds = array<i64: 2, 1>, scalar_prefetch = 0 : i64, scratch_operands = 0 : i64, tpu.core_type = #tpu.core_type<tc>, window_params = [{pipeline_mode = #tpu.pipeline_mode<synchronous>, transform_indices = @transform_0, window_bounds = array<i64: 1, 256>}, {pipeline_mode = #tpu.pipeline_mode<synchronous>, transform_indices = @transform_1, window_bounds = array<i64: 1, 256>}, {transform_indices = @transform_2, window_bounds = array<i64: 1, 4, 256>}, {transform_indices = @transform_3, window_bounds = array<i64: 1, 4, 4, 256>}]} {
    %c0 = arith.constant 0 : index
    %c0_0 = arith.constant 0 : index
    %c0_1 = arith.constant 0 : index
    %0 = vector.load %arg4[%c0, %c0_0, %c0_1] : memref<1x4x256xf32, #tpu.memory_space<vmem>>, vector<1x4x256xf32>
    %1 = vector.shape_cast %0 : vector<1x4x256xf32> to vector<4x256xf32>
    %c0_2 = arith.constant 0 : index
    %c0_3 = arith.constant 0 : index
    %2 = vector.load %arg2[%c0_2, %c0_3] : memref<1x256xi32, #tpu.memory_space<vmem>>, vector<1x256xi32>
    %3 = vector.shape_cast %2 : vector<1x256xi32> to vector<1x256xi32>
    %4 = vector.broadcast %3 : vector<1x256xi32> to vector<4x256xi32>
    %c0_4 = arith.constant 0 : index
    %c0_5 = arith.constant 0 : index
    %5 = vector.load %arg3[%c0_4, %c0_5] : memref<1x256xi32, #tpu.memory_space<vmem>>, vector<1x256xi32>
    %6 = vector.shape_cast %5 : vector<1x256xi32> to vector<1x256xi32>
    %7 = vector.broadcast %6 : vector<1x256xi32> to vector<4x256xi32>
    %c1_i32 = arith.constant 1 : i32
    %8 = vector.broadcast %c1_i32 : i32 to vector<4x256xi32>
    %9 = arith.cmpi sge, %4, %8 : vector<4x256xi32>
    %c2_i32 = arith.constant 2 : i32
    %10 = vector.broadcast %c2_i32 : i32 to vector<4x256xi32>
    %11 = arith.cmpi sge, %4, %10 : vector<4x256xi32>
    %c14_i32 = arith.constant 14 : i32
    %12 = vector.broadcast %c14_i32 : i32 to vector<4x256xi32>
    %13 = arith.cmpi sle, %4, %12 : vector<4x256xi32>
    %c13_i32 = arith.constant 13 : i32
    %14 = vector.broadcast %c13_i32 : i32 to vector<4x256xi32>
    %15 = arith.cmpi sle, %4, %14 : vector<4x256xi32>
    %c1_i32_6 = arith.constant 1 : i32
    %16 = vector.broadcast %c1_i32_6 : i32 to vector<4x256xi32>
    %17 = arith.cmpi sge, %7, %16 : vector<4x256xi32>
    %c2_i32_7 = arith.constant 2 : i32
    %18 = vector.broadcast %c2_i32_7 : i32 to vector<4x256xi32>
    %19 = arith.cmpi sge, %7, %18 : vector<4x256xi32>
    %c14_i32_8 = arith.constant 14 : i32
    %20 = vector.broadcast %c14_i32_8 : i32 to vector<4x256xi32>
    %21 = arith.cmpi sle, %7, %20 : vector<4x256xi32>
    %c13_i32_9 = arith.constant 13 : i32
    %22 = vector.broadcast %c13_i32_9 : i32 to vector<4x256xi32>
    %23 = arith.cmpi sle, %7, %22 : vector<4x256xi32>
    %c0_10 = arith.constant 0 : index
    %c0_11 = arith.constant 0 : index
    %c0_12 = arith.constant 0 : index
    %c0_13 = arith.constant 0 : index
    %24 = vector.load %arg5[%c0_10, %c0_11, %c0_12, %c0_13] : memref<1x4x4x256xf32, #tpu.memory_space<vmem>>, vector<1x1x4x256xf32>
    %25 = vector.shape_cast %24 : vector<1x1x4x256xf32> to vector<4x256xf32>
    %26 = vector.shape_cast %1 : vector<4x256xf32> to vector<1x1x4x256xf32>
    tpu.vector_store %arg5[%c0_10, %c0_11, %c0_12, %c0_13], %26 {strides = array<i32>} : memref<1x4x4x256xf32, #tpu.memory_space<vmem>>, vector<1x1x4x256xf32>,
    %c1_i32_14 = arith.constant 1 : i32
    %27 = tpu.dynamic_rotate %1 by %c1_i32_14 dim 1 : vector<4x256xf32>, i32 -> vector<4x256xf32>
    %cst = arith.constant 0xFF800000 : f32
    %28 = vector.broadcast %cst : f32 to vector<4x256xf32>
    %29 = arith.select %9, %27, %28 : vector<4x256xi1>, vector<4x256xf32>
    %c2_i32_15 = arith.constant 2 : i32
    %30 = tpu.dynamic_rotate %1 by %c2_i32_15 dim 1 : vector<4x256xf32>, i32 -> vector<4x256xf32>
    %cst_16 = arith.constant 0xFF800000 : f32
    %31 = vector.broadcast %cst_16 : f32 to vector<4x256xf32>
    %32 = arith.select %11, %30, %31 : vector<4x256xi1>, vector<4x256xf32>
    %c255_i32 = arith.constant 255 : i32
    %33 = tpu.dynamic_rotate %1 by %c255_i32 dim 1 : vector<4x256xf32>, i32 -> vector<4x256xf32>
    %cst_17 = arith.constant 0xFF800000 : f32
    %34 = vector.broadcast %cst_17 : f32 to vector<4x256xf32>
    %35 = arith.select %13, %33, %34 : vector<4x256xi1>, vector<4x256xf32>
    %c254_i32 = arith.constant 254 : i32
    %36 = tpu.dynamic_rotate %1 by %c254_i32 dim 1 : vector<4x256xf32>, i32 -> vector<4x256xf32>
    %cst_18 = arith.constant 0xFF800000 : f32
    %37 = vector.broadcast %cst_18 : f32 to vector<4x256xf32>
    %38 = arith.select %15, %36, %37 : vector<4x256xi1>, vector<4x256xf32>
    %39 = arith.maximumf %29, %32 : vector<4x256xf32>
    %40 = arith.maximumf %35, %38 : vector<4x256xf32>
    %41 = arith.maximumf %39, %40 : vector<4x256xf32>
    %42 = arith.maximumf %41, %1 : vector<4x256xf32>
    %c16_i32 = arith.constant 16 : i32
    %43 = tpu.dynamic_rotate %42 by %c16_i32 dim 1 : vector<4x256xf32>, i32 -> vector<4x256xf32>
    %cst_19 = arith.constant 0xFF800000 : f32
    %44 = vector.broadcast %cst_19 : f32 to vector<4x256xf32>
    %45 = arith.select %17, %43, %44 : vector<4x256xi1>, vector<4x256xf32>
    %c32_i32 = arith.constant 32 : i32
    %46 = tpu.dynamic_rotate %42 by %c32_i32 dim 1 : vector<4x256xf32>, i32 -> vector<4x256xf32>
    %cst_20 = arith.constant 0xFF800000 : f32
    %47 = vector.broadcast %cst_20 : f32 to vector<4x256xf32>
    %48 = arith.select %19, %46, %47 : vector<4x256xi1>, vector<4x256xf32>
    %c240_i32 = arith.constant 240 : i32
    %49 = tpu.dynamic_rotate %42 by %c240_i32 dim 1 : vector<4x256xf32>, i32 -> vector<4x256xf32>
    %cst_21 = arith.constant 0xFF800000 : f32
    %50 = vector.broadcast %cst_21 : f32 to vector<4x256xf32>
    %51 = arith.select %21, %49, %50 : vector<4x256xi1>, vector<4x256xf32>
    %c224_i32 = arith.constant 224 : i32
    %52 = tpu.dynamic_rotate %42 by %c224_i32 dim 1 : vector<4x256xf32>, i32 -> vector<4x256xf32>
    %cst_22 = arith.constant 0xFF800000 : f32
    %53 = vector.broadcast %cst_22 : f32 to vector<4x256xf32>
    %54 = arith.select %23, %52, %53 : vector<4x256xi1>, vector<4x256xf32>
    %55 = arith.maximumf %45, %48 : vector<4x256xf32>
    %56 = arith.maximumf %51, %54 : vector<4x256xf32>
    %57 = arith.maximumf %55, %56 : vector<4x256xf32>
    %58 = arith.maximumf %57, %42 : vector<4x256xf32>
    %c0_23 = arith.constant 0 : index
    %c1 = arith.constant 1 : index
    %c0_24 = arith.constant 0 : index
    %c0_25 = arith.constant 0 : index
    %59 = vector.load %arg5[%c0_23, %c1, %c0_24, %c0_25] : memref<1x4x4x256xf32, #tpu.memory_space<vmem>>, vector<1x1x4x256xf32>
    %60 = vector.shape_cast %59 : vector<1x1x4x256xf32> to vector<4x256xf32>
    %61 = vector.shape_cast %58 : vector<4x256xf32> to vector<1x1x4x256xf32>
    tpu.vector_store %arg5[%c0_23, %c1, %c0_24, %c0_25], %61 {strides = array<i32>} : memref<1x4x4x256xf32, #tpu.memory_space<vmem>>, vector<1x1x4x256xf32>,
    %c1_i32_26 = arith.constant 1 : i32
    %62 = tpu.dynamic_rotate %58 by %c1_i32_26 dim 1 : vector<4x256xf32>, i32 -> vector<4x256xf32>
    %cst_27 = arith.constant 0xFF800000 : f32
    %63 = vector.broadcast %cst_27 : f32 to vector<4x256xf32>
    %64 = arith.select %9, %62, %63 : vector<4x256xi1>, vector<4x256xf32>
    %c2_i32_28 = arith.constant 2 : i32
    %65 = tpu.dynamic_rotate %58 by %c2_i32_28 dim 1 : vector<4x256xf32>, i32 -> vector<4x256xf32>
    %cst_29 = arith.constant 0xFF800000 : f32
    %66 = vector.broadcast %cst_29 : f32 to vector<4x256xf32>
    %67 = arith.select %11, %65, %66 : vector<4x256xi1>, vector<4x256xf32>
    %c255_i32_30 = arith.constant 255 : i32
    %68 = tpu.dynamic_rotate %58 by %c255_i32_30 dim 1 : vector<4x256xf32>, i32 -> vector<4x256xf32>
    %cst_31 = arith.constant 0xFF800000 : f32
    %69 = vector.broadcast %cst_31 : f32 to vector<4x256xf32>
    %70 = arith.select %13, %68, %69 : vector<4x256xi1>, vector<4x256xf32>
    %c254_i32_32 = arith.constant 254 : i32
    %71 = tpu.dynamic_rotate %58 by %c254_i32_32 dim 1 : vector<4x256xf32>, i32 -> vector<4x256xf32>
    %cst_33 = arith.constant 0xFF800000 : f32
    %72 = vector.broadcast %cst_33 : f32 to vector<4x256xf32>
    %73 = arith.select %15, %71, %72 : vector<4x256xi1>, vector<4x256xf32>
    %74 = arith.maximumf %64, %67 : vector<4x256xf32>
    %75 = arith.maximumf %70, %73 : vector<4x256xf32>
    %76 = arith.maximumf %74, %75 : vector<4x256xf32>
    %77 = arith.maximumf %76, %58 : vector<4x256xf32>
    %c16_i32_34 = arith.constant 16 : i32
    %78 = tpu.dynamic_rotate %77 by %c16_i32_34 dim 1 : vector<4x256xf32>, i32 -> vector<4x256xf32>
    %cst_35 = arith.constant 0xFF800000 : f32
    %79 = vector.broadcast %cst_35 : f32 to vector<4x256xf32>
    %80 = arith.select %17, %78, %79 : vector<4x256xi1>, vector<4x256xf32>
    %c32_i32_36 = arith.constant 32 : i32
    %81 = tpu.dynamic_rotate %77 by %c32_i32_36 dim 1 : vector<4x256xf32>, i32 -> vector<4x256xf32>
    %cst_37 = arith.constant 0xFF800000 : f32
    %82 = vector.broadcast %cst_37 : f32 to vector<4x256xf32>
    %83 = arith.select %19, %81, %82 : vector<4x256xi1>, vector<4x256xf32>
    %c240_i32_38 = arith.constant 240 : i32
    %84 = tpu.dynamic_rotate %77 by %c240_i32_38 dim 1 : vector<4x256xf32>, i32 -> vector<4x256xf32>
    %cst_39 = arith.constant 0xFF800000 : f32
    %85 = vector.broadcast %cst_39 : f32 to vector<4x256xf32>
    %86 = arith.select %21, %84, %85 : vector<4x256xi1>, vector<4x256xf32>
    %c224_i32_40 = arith.constant 224 : i32
    %87 = tpu.dynamic_rotate %77 by %c224_i32_40 dim 1 : vector<4x256xf32>, i32 -> vector<4x256xf32>
    %cst_41 = arith.constant 0xFF800000 : f32
    %88 = vector.broadcast %cst_41 : f32 to vector<4x256xf32>
    %89 = arith.select %23, %87, %88 : vector<4x256xi1>, vector<4x256xf32>
    %90 = arith.maximumf %80, %83 : vector<4x256xf32>
    %91 = arith.maximumf %86, %89 : vector<4x256xf32>
    %92 = arith.maximumf %90, %91 : vector<4x256xf32>
    %93 = arith.maximumf %92, %77 : vector<4x256xf32>
    %c0_42 = arith.constant 0 : index
    %c2 = arith.constant 2 : index
    %c0_43 = arith.constant 0 : index
    %c0_44 = arith.constant 0 : index
    %94 = vector.load %arg5[%c0_42, %c2, %c0_43, %c0_44] : memref<1x4x4x256xf32, #tpu.memory_space<vmem>>, vector<1x1x4x256xf32>
    %95 = vector.shape_cast %94 : vector<1x1x4x256xf32> to vector<4x256xf32>
    %96 = vector.shape_cast %93 : vector<4x256xf32> to vector<1x1x4x256xf32>
    tpu.vector_store %arg5[%c0_42, %c2, %c0_43, %c0_44], %96 {strides = array<i32>} : memref<1x4x4x256xf32, #tpu.memory_space<vmem>>, vector<1x1x4x256xf32>,
    %c1_i32_45 = arith.constant 1 : i32
    %97 = tpu.dynamic_rotate %93 by %c1_i32_45 dim 1 : vector<4x256xf32>, i32 -> vector<4x256xf32>
    %cst_46 = arith.constant 0xFF800000 : f32
    %98 = vector.broadcast %cst_46 : f32 to vector<4x256xf32>
    %99 = arith.select %9, %97, %98 : vector<4x256xi1>, vector<4x256xf32>
    %c2_i32_47 = arith.constant 2 : i32
    %100 = tpu.dynamic_rotate %93 by %c2_i32_47 dim 1 : vector<4x256xf32>, i32 -> vector<4x256xf32>
    %cst_48 = arith.constant 0xFF800000 : f32
    %101 = vector.broadcast %cst_48 : f32 to vector<4x256xf32>
    %102 = arith.select %11, %100, %101 : vector<4x256xi1>, vector<4x256xf32>
    %c255_i32_49 = arith.constant 255 : i32
    %103 = tpu.dynamic_rotate %93 by %c255_i32_49 dim 1 : vector<4x256xf32>, i32 -> vector<4x256xf32>
    %cst_50 = arith.constant 0xFF800000 : f32
    %104 = vector.broadcast %cst_50 : f32 to vector<4x256xf32>
    %105 = arith.select %13, %103, %104 : vector<4x256xi1>, vector<4x256xf32>
    %c254_i32_51 = arith.constant 254 : i32
    %106 = tpu.dynamic_rotate %93 by %c254_i32_51 dim 1 : vector<4x256xf32>, i32 -> vector<4x256xf32>
    %cst_52 = arith.constant 0xFF800000 : f32
    %107 = vector.broadcast %cst_52 : f32 to vector<4x256xf32>
    %108 = arith.select %15, %106, %107 : vector<4x256xi1>, vector<4x256xf32>
    %109 = arith.maximumf %99, %102 : vector<4x256xf32>
    %110 = arith.maximumf %105, %108 : vector<4x256xf32>
    %111 = arith.maximumf %109, %110 : vector<4x256xf32>
    %112 = arith.maximumf %111, %93 : vector<4x256xf32>
    %c16_i32_53 = arith.constant 16 : i32
    %113 = tpu.dynamic_rotate %112 by %c16_i32_53 dim 1 : vector<4x256xf32>, i32 -> vector<4x256xf32>
    %cst_54 = arith.constant 0xFF800000 : f32
    %114 = vector.broadcast %cst_54 : f32 to vector<4x256xf32>
    %115 = arith.select %17, %113, %114 : vector<4x256xi1>, vector<4x256xf32>
    %c32_i32_55 = arith.constant 32 : i32
    %116 = tpu.dynamic_rotate %112 by %c32_i32_55 dim 1 : vector<4x256xf32>, i32 -> vector<4x256xf32>
    %cst_56 = arith.constant 0xFF800000 : f32
    %117 = vector.broadcast %cst_56 : f32 to vector<4x256xf32>
    %118 = arith.select %19, %116, %117 : vector<4x256xi1>, vector<4x256xf32>
    %c240_i32_57 = arith.constant 240 : i32
    %119 = tpu.dynamic_rotate %112 by %c240_i32_57 dim 1 : vector<4x256xf32>, i32 -> vector<4x256xf32>
    %cst_58 = arith.constant 0xFF800000 : f32
    %120 = vector.broadcast %cst_58 : f32 to vector<4x256xf32>
    %121 = arith.select %21, %119, %120 : vector<4x256xi1>, vector<4x256xf32>
    %c224_i32_59 = arith.constant 224 : i32
    %122 = tpu.dynamic_rotate %112 by %c224_i32_59 dim 1 : vector<4x256xf32>, i32 -> vector<4x256xf32>
    %cst_60 = arith.constant 0xFF800000 : f32
    %123 = vector.broadcast %cst_60 : f32 to vector<4x256xf32>
    %124 = arith.select %23, %122, %123 : vector<4x256xi1>, vector<4x256xf32>
    %125 = arith.maximumf %115, %118 : vector<4x256xf32>
    %126 = arith.maximumf %121, %124 : vector<4x256xf32>
    %127 = arith.maximumf %125, %126 : vector<4x256xf32>
    %128 = arith.maximumf %127, %112 : vector<4x256xf32>
    %c0_61 = arith.constant 0 : index
    %c3 = arith.constant 3 : index
    %c0_62 = arith.constant 0 : index
    %c0_63 = arith.constant 0 : index
    %129 = vector.load %arg5[%c0_61, %c3, %c0_62, %c0_63] : memref<1x4x4x256xf32, #tpu.memory_space<vmem>>, vector<1x1x4x256xf32>
    %130 = vector.shape_cast %129 : vector<1x1x4x256xf32> to vector<4x256xf32>
    %131 = vector.shape_cast %128 : vector<4x256xf32> to vector<1x1x4x256xf32>
    tpu.vector_store %arg5[%c0_61, %c3, %c0_62, %c0_63], %131 {strides = array<i32>} : memref<1x4x4x256xf32, #tpu.memory_space<vmem>>, vector<1x1x4x256xf32>,
    return
  }
  func.func @transform_0(%arg0: i32, %arg1: i32) -> (i32, i32) {
    %c0_i32 = arith.constant 0 : i32
    %c0_i32_0 = arith.constant 0 : i32
    %c0_i32_1 = arith.constant 0 : i32
    return %c0_i32, %c0_i32_0 : i32, i32
  }
  func.func @transform_1(%arg0: i32, %arg1: i32) -> (i32, i32) {
    %c0_i32 = arith.constant 0 : i32
    %c0_i32_0 = arith.constant 0 : i32
    %c0_i32_1 = arith.constant 0 : i32
    return %c0_i32, %c0_i32_0 : i32, i32
  }
  func.func @transform_2(%arg0: i32, %arg1: i32) -> (i32, i32, i32) {
    %c0_i32 = arith.constant 0 : i32
    %c0_i32_0 = arith.constant 0 : i32
    return %arg0, %arg1, %c0_i32 : i32, i32, i32
  }
  func.func @transform_3(%arg0: i32, %arg1: i32) -> (i32, i32, i32, i32) {
    %c0_i32 = arith.constant 0 : i32
    %c0_i32_0 = arith.constant 0 : i32
    %c0_i32_1 = arith.constant 0 : i32
    return %arg0, %c0_i32, %arg1, %c0_i32_0 : i32, i32, i32, i32
  }
}

</mosaic_0001>

<bundles_post_ra>
// kernel: tpu_custom_call.1
= control target key start
LH: loop header
LB: loop body
LE: loop exit
PB: predicated region body
PF: predicated region fallthrough
CT: control target
= control target key end

     0   :  { %8 = vsyncpa [#allocation3], 0  ;;  %s1450_s0 = inlined_call_operand.hbm [shape: s32[1,256], index: 0, kind: input, shape index: {}]   ;;  %s1451_s1 = inlined_call_operand.vmem [shape: s32[1,256], index: 1, kind: input, shape index: {}]   ;;  %s1452_s2 = inlined_call_operand.hbm [shape: f32[2,4,256], index: 2, kind: input, shape index: {}]   ;;  %s1453_s3 = inlined_call_operand.hbm [shape: f32[2,4,4,256], index: 3, kind: output, shape index: {}]  }
   0x1   :  { %9 = vsyncpa [#allocation6], 0 }
   0x2   :  { %11 = vsyncpa [#allocation6 + $0x1], 0 }
   0x3   :  { %12 = vsyncpa [#allocation4], 0 }
   0x4   :  { %14 = vsyncpa [#allocation4 + $0x1], 0  ;;  %s925_s12 = smov 0   ;;  %s927_s13 = smov 0  }
   0x5   :  { %s929_s14 = smov 0   ;;  %s931_s15 = smov 0  }
   0x6   :  { %s933_s16 = smov 0   ;;  %s935_s17 = smov 0  }
   0x7 LB: > { %s640_s18 = sadd.s32 4294967295, %s890_s17   ;;  %s641_s19 = sadd.s32 4294967294, %s890_s17   ;;  %s890_s17 = sphi %s935_s17, %s20_s17   ;;  %s886_s16 = sphi %s933_s16, %s1525_s16   ;;  %s882_s15 = sphi %s931_s15, %s1524_s15   ;;  %s878_s14 = sphi %s929_s14, %s1523_s14   ;;  %s874_s13 = sphi %s927_s13, %s1522_s13   ;;  %s870_s12 = sphi %s925_s12, %s1521_s12  }
   0x8   : > { %p96_p0 = scmp.ne.s32.totalorder %s874_s13, %s870_s12  ;;  %p959_p1 = scmp.eq.s32.totalorder %s640_s18, 0 }
   0x9   : > { %p963_p2 = scmp.eq.s32.totalorder %s640_s18, 1  ;;  %p128_p3 = scmp.eq.s32.totalorder %s641_s19, 1 }
   0xa   : > { %s1473_s20 = scalar_select %p959_p1, 1, 0 }
   0xb   : > { %s1474_s21 = scalar_select %p963_p2, 1, 0 }
   0xc   : > { %p969_p4 = por %p959_p1, %p96_p0  ;;  %p642_p5 = scmp.ge.s32.totalorder %s890_s17, 1 }
   0xd   : > { %p974_p6 = por %p128_p3, %p96_p0  ;;  %p135_p7 = scmp.lt.s32.totalorder %s890_s17, 3 }
   0xe   : > { %s1475_s22 = scalar_select %p969_p4, 1, 0 }
   0xf   : > { %s1476_s23 = scalar_select %p974_p6, 1, 0 }
  0x10   : > { %p979_p8 = pnand %p642_p5, %p135_p7  ;;  %s892_s25 = smov [#allocation2]  }
  0x11   : > { %s148_s26 = sshll.u32 %s892_s25, 4  ;;  %s32_s28 = sadd.s32 1, %s886_s16  ;;  %s149_s26 = int_to_ptr.vmem [resolvable:$true] %s148_s26 }
  0x12   : > { %s1477_s24 = scalar_select %p979_p8, 1, 0 }
  0x13   : > { %p670_p10 = pneg %p979_p8  ;;  %s83_s29 = sadd.s32 1, %s878_s14 }
  0x14   : > { %p994_p12 = scmp.ge.s32.totalorder %s32_s28, 2  ;;  %s746_s6 = scalar_lea.hbm %s1450_s0, 32 }
  0x15   : > { %p988_p11 = pnand %p670_p10, %p959_p1  ;;  %p747_p13 = scmp.ne.s32.totalorder %s1450_s0, %s746_s6 }
  0x16   : > { %s1479_s30 = scalar_select %p994_p12, 1, 0 }
  0x17   : > { %p748_p0 = pneg %p988_p11  ;;  %p753_p7 = scmp.lt.u32.totalorder %s746_s6, %s1450_s0 }
  0x19   : > { %p749_p3 = pnand %p748_p0, %p747_p13 }
  0x1b   : > { %p750_p5 = pneg %p749_p3 }
  0x1d   : > { %p755_p10 = pnand %p753_p7, %p750_p5 }
  0x1f   : > { %758 = shalt.err (!%p755_p10)
}
  0x20   : > { %s759_s11 = scalar_lea.vmem %s149_s26, 32  ;;  %p767_p1 = scmp.lt.s32.totalorder %s149_s26, %s149_s26 }
  0x21   : > { %p760_p9 = scmp.ne.s32.totalorder %s149_s26, %s759_s11  ;;  %p768_p8 = scmp.lt.s32.totalorder %s759_s11, %s759_s11 }
  0x23   : > { %p762_p6 = pnand %p760_p9, %p748_p0  ;;  %p769_p2 = por %p768_p8, %p767_p1 }
  0x25   : > { %p763_p4 = pneg %p762_p6 }
  0x27   : > { %p770_p12 = pnand %p769_p2, %p763_p4 }
  0x29   : > { %773 = shalt.err (!%p770_p12)
}
  0x2a   : > { %673 = dma.hbm_to_vmem [thread:$0]  (!%p988_p11), %s1450_s0, 32, %s149_s26, [#allocation3]  }
  0x2b   : > { %p1480_p1 = scmp.ne.s32.totalorder %s1479_s30, 0  ;;  %p90_p2 = scmp.ne.s32.totalorder %s878_s14, %s874_s13 }
  0x2c   : > { %p91_p4 = scmp.eq.s32.totalorder %s890_s17, 0  ;;  %p683_p6 = scmp.lt.s32.totalorder %s890_s17, 2 }
  0x2d   : > { %s1527_s28 = smov (%p1480_p1, %s32_s28), 0  ;;  %p1481_p12 = scmp.ne.s32.totalorder %s1474_s21, 0 }
  0x2e   : > { %s78_s25 = ssub.s32 %s886_s16, %s1527_s28  ;;  %p92_p9 = por %p91_p4, %p90_p2 }
  0x2f   : > { %p81_p8 = scmp.eq.s32.totalorder %s78_s25, 0  ;;  %p1026_p13 = por %p1481_p12, %p90_p2 }
  0x30   : > { %s162_s4 = sand.u32 1, %s878_s14   ;;  %s660_s30 = sshll.u32 %s886_s16, 7 }
  0x31   : > { %s1034_s5 = scalar_select %p81_p8, %s878_s14, %s83_s29  }
  0x32   : > { %s645_s26 = sshll.u32 %s162_s4, 3  ;;  %s1040_s8 = scalar_lea.hbm %s1452_s2, %s660_s30 }
  0x33   : > { %s166_s21 = scalar_lea.vmem [#allocation5], %s645_s26  ;;  %p1044_p11 = pnand %p683_p6, %p92_p9 }
  0x34   : > { %s176_s9 = sshll.u32 %s166_s21, 4  ;;  %s163_s29 = scalar_lea.sflag [#allocation6], %s162_s4  ;;  %s1042_s9 = int_to_ptr.vmem [resolvable:$true] %s176_s9 }
  0x35   : > { %s774_s11 = scalar_lea.hbm %s1040_s8, 128  ;;  %p776_p3 = pneg %p1044_p11 }
  0x36   : > { %p775_p0 = scmp.ne.s32.totalorder %s1040_s8, %s774_s11  ;;  %s779_s25 = scalar_lea.hbm %s1452_s2, 256 }
  0x37   : > { %p780_p10 = scmp.lt.u32.totalorder %s1040_s8, %s1452_s2  ;;  %p781_p1 = scmp.lt.u32.totalorder %s779_s25, %s774_s11 }
  0x38   : > { %p777_p5 = pnand %p776_p3, %p775_p0  ;;  %p783_p4 = scmp.lt.u32.totalorder %s774_s11, %s1040_s8 }
  0x39   : > { %p782_p2 = por %p781_p1, %p780_p10 }
  0x3a   : > { %p778_p7 = pneg %p777_p5 }
  0x3b   : > { %p784_p6 = por %p783_p4, %p782_p2 }
  0x3d   : > { %p785_p8 = pnand %p784_p6, %p778_p7 }
  0x3f   : > { %788 = shalt.err (!%p785_p8)
}
  0x40   : > { %s789_s4 = scalar_lea.vmem %s1042_s9, 128  ;;  %s893_s6 = smov [#allocation5]  }
  0x41   : > { %p790_p9 = scmp.ne.s32.totalorder %s1042_s9, %s789_s4  ;;  %s794_s7 = sshll.u32 %s893_s6, 4  ;;  %s795_s7 = int_to_ptr.vmem [resolvable:$false] %s794_s7 }
  0x42   : > { %s796_s21 = scalar_lea.vmem %s795_s7, 256  ;;  %p797_p5 = scmp.lt.s32.totalorder %s1042_s9, %s795_s7 }
  0x43   : > { %p792_p12 = pnand %p790_p9, %p776_p3  ;;  %p798_p10 = scmp.lt.s32.totalorder %s796_s21, %s789_s4 }
  0x45   : > { %p793_p0 = pneg %p792_p12  ;;  %p799_p1 = por %p798_p10, %p797_p5 }
  0x47   : > { %p800_p2 = pnand %p799_p1, %p793_p0 }
  0x49   : > { %803 = shalt.err (!%p800_p2)
}
  0x4a   : > { %677 = dma.hbm_to_vmem [thread:$0]  (!%p1044_p11), %s1040_s8, 128, %s1042_s9, %s163_s29  }
  0x4b   : > { %p1484_p7 = scmp.ne.s32.totalorder %s1477_s24, 0 }
  0x4c   : > { %p1485_p3 = scmp.ne.s32.totalorder (!%p1484_p7), %s1473_s20, 0 }
  0x4d   : > { %185 = sbr.rel (%p1484_p7) target bundleno = 918 (0x396), region = 32 }
  0x54   : > { %857 = dma.done.wait (%p1485_p3), [#allocation3], 32  }
  0x55   : > { %859 = vsyncadd (%p1485_p3), [#allocation3], 4294967264  ;;  %s1080_s11 = sand.u32 1, %s874_s13   ;;  %p1486_p4 = scmp.ne.s32.totalorder %s1475_s22, 0 }
  0x56   : > { %s650_s18 = sshll.u32 %s1080_s11, 3  ;;  %s192_s10 = scalar_lea.sflag [#allocation6], %s1080_s11 }
  0x57   : > { %s195_s19 = scalar_lea.vmem [#allocation5], %s650_s18 }
  0x58   : > { %861 = dma.done.wait (%p1486_p4), %s192_s10, 128  }
  0x59   : > { %863 = vsyncadd (%p1486_p4), %s192_s10, 4294967168  ;;  %s651_s24 = sshll.u32 %s1080_s11, 5  ;;  %v1089_v0 = vld [vmem:[%s195_s19] sm:$0xff]  ;;  %s894_s20 = smov 2   ;;  %v220_v2 = vlaneseq  ;;  %v219_v8 = vld [vmem:[#allocation2] sm:$0x3] }
  0x5a   : > { %268 = vrot.lane.b32.xlu1 %v1089_v0, %s894_s20  ;;  %s1093_s8 = scalar_lea.vmem [#allocation7], %s651_s24  ;;  %s895_s9 = smov 1   ;;  %v255_v1 = vcombine.high %v1089_v0, %v1089_v0  ;;  %v228_v44 = vld [vmem:[%s1451_s1] sm:$0x3] }
  0x5b   : > { %253 = vst [vmem:[%s1093_s8] sm:$0xff] %v1089_v0  ;;  %257 = vrot.lane.b32.xlu0 %v1089_v0, %s895_s9  ;;  %s896_s22 = smov 127   ;;  %s897_s29 = smov 126   ;;  %v1109_v3 = vshrl.u32 %v220_v2, 7  ;;  %v1113_v9 = vand.u32 127, %v220_v2 }
  0x5c   : > { %s898_s25 = smov 16   ;;  %s899_s26 = smov 32  }
  0x5d   : > { %v222_v6 = vsub.s32 0, %v1109_v3  ;;  %v226_v7 = vsub.s32 1, %v1109_v3  ;;  %vm1468_vm0 = vcmp.lt.s32.totalorder %v1113_v9, 1  ;;  %vm1466_vm1 = vcmp.lt.s32.totalorder %v1113_v9, 2  ;;  %s900_s30 = smov 112   ;;  %s901_s4 = smov 96  }
  0x5e   : > { %270 = vrot.lane.b32.xlu1 %v255_v1, %s894_s20  ;;  %vm1470_vm4 = vcmp.lt.s32.totalorder %v1113_v9, 127  ;;  %vm1462_vm5 = vcmp.lt.s32.totalorder %v1113_v9, 126  ;;  %vm1464_vm12 = vcmp.lt.s32.totalorder %v1113_v9, 32  ;;  %vm307_vm13 = vcmp.lt.s32.totalorder %v1113_v9, 16  ;;  %s661_s21 = sshll.u32 %s882_s15, 9  ;;  %s541_s18 = sshll.u32 %s1093_s8, 4  ;;  %s1400_s18 = int_to_ptr.vmem [resolvable:$true] %s541_s18 }
  0x5f   : > { %277 = vrot.lane.b32.xlu0 %v1089_v0, %s896_s22  ;;  %v1117_v11 = vrot.slane %v219_v8, %v222_v6  ;;  %v1121_v12 = vrot.slane %v219_v8, %v226_v7  ;;  %v1181_v45 = vrot.slane %v228_v44, %v222_v6  ;;  %v1185_v46 = vrot.slane %v228_v44, %v226_v7  ;;  %s1398_s24 = scalar_lea.hbm %s1453_s3, %s661_s21  ;;  %s902_s15 = smov [#allocation7]  }
  0x61   : > { %vm1471_vm2 = vcmp.ge.s32.totalorder %v1117_v11, 2  ;;  %vm1472_vm3 = vcmp.ge.s32.totalorder %v1121_v12, 2  ;;  %vm1465_vm6 = vcmp.ge.s32.totalorder %v1117_v11, 1  ;;  %vm1463_vm7 = vcmp.ge.s32.totalorder %v1121_v12, 1 }
  0x62   : > { %279 = vrot.lane.b32.xlu1 %v255_v1, %s896_s22  ;;  %vm1461_vm8 = vcmp.le.s32.totalorder %v1117_v11, 14  ;;  %vm1460_vm9 = vcmp.le.s32.totalorder %v1121_v12, 14  ;;  %vm1459_vm10 = vcmp.le.s32.totalorder %v1117_v11, 13  ;;  %vm1458_vm11 = vcmp.le.s32.totalorder %v1121_v12, 13 }
  0x63   : > { %259 = vrot.lane.b32.xlu0 %v255_v1, %s895_s9  ;;  %vm245_vm14 = vcmp.ge.s32.totalorder %v1181_v45, 1  ;;  %vm246_vm15 = vcmp.ge.s32.totalorder %v1185_v46, 1 }
  0x66   : > { %288 = vrot.lane.b32.xlu1 %v255_v1, %s897_s29 }
  0x67   : > { %286 = vrot.lane.b32.xlu0 %v1089_v0, %s897_s29 }
  0xcc   : > { %v269_v4 = vpop.permute.xlu1 %268 }
  0xcd   : > { %v258_v5 = vpop.permute.xlu0 %257 }
  0xd0   : > { %v271_v13 = vpop.permute.xlu1 %270 }
  0xd1   : > { %v278_v10 = vpop.permute.xlu0 %277  ;;  %v273_v18 = vsel %vm1466_vm1, %v269_v4, %v271_v13  ;;  %v274_v19 = vsel %vm1466_vm1, %v271_v13, %v269_v4 }
  0xd2   : > { %v275_v26 = vsel %vm1471_vm2, %v274_v19, -inf  ;;  %v276_v27 = vsel %vm1472_vm3, %v273_v18, -inf }
  0xd4   : > { %v280_v14 = vpop.permute.xlu1 %279 }
  0xd5   : > { %v260_v15 = vpop.permute.xlu0 %259  ;;  %v282_v20 = vsel %vm1470_vm4, %v278_v10, %v280_v14  ;;  %v283_v21 = vsel %vm1470_vm4, %v280_v14, %v278_v10 }
  0xd6   : > { %v264_v16 = vsel %vm1468_vm0, %v258_v5, %v260_v15  ;;  %v265_v17 = vsel %vm1468_vm0, %v260_v15, %v258_v5  ;;  %v284_v30 = vsel %vm1461_vm8, %v282_v20, -inf  ;;  %v285_v31 = vsel %vm1460_vm9, %v283_v21, -inf }
  0xd7   : > { %v266_v22 = vsel %vm1465_vm6, %v265_v17, -inf  ;;  %v267_v23 = vsel %vm1463_vm7, %v264_v16, -inf  ;;  %vm248_vm9 = vcmp.ge.s32.totalorder %v1185_v46, 2  ;;  %vm249_vm8 = vcmp.le.s32.totalorder %v1181_v45, 14 }
  0xd8   : > { %v289_v24 = vpop.permute.xlu1 %288  ;;  %v295_v34 = vmax.f32 %v266_v22, %v275_v26  ;;  %v296_v35 = vmax.f32 %v267_v23, %v276_v27  ;;  %vm334_vm7 = vcmp.lt.s32.totalorder %v1113_v9, 96  ;;  %vm1467_vm6 = vcmp.le.s32.totalorder %v1185_v46, 13 }
  0xd9   : > { %v287_v25 = vpop.permute.xlu0 %286 }
  0xda   : > { %v291_v28 = vsel %vm1462_vm5, %v287_v25, %v289_v24  ;;  %v292_v29 = vsel %vm1462_vm5, %v289_v24, %v287_v25  ;;  %vm250_vm5 = vcmp.le.s32.totalorder %v1185_v46, 14 }
  0xdb   : > { %v293_v32 = vsel %vm1459_vm10, %v291_v28, -inf  ;;  %v294_v33 = vsel %vm1458_vm11, %v292_v29, -inf  ;;  %vm247_vm11 = vcmp.ge.s32.totalorder %v1181_v45, 2  ;;  %vm325_vm10 = vcmp.lt.s32.totalorder %v1113_v9, 112 }
  0xdc   : > { %v297_v36 = vmax.f32 %v284_v30, %v293_v32  ;;  %v298_v37 = vmax.f32 %v285_v31, %v294_v33 }
  0xde   : > { %v299_v38 = vmax.f32 %v295_v34, %v297_v36  ;;  %v300_v39 = vmax.f32 %v296_v35, %v298_v37 }
  0xe0   : > { %v301_v40 = vmax.f32 %v299_v38, %v1089_v0  ;;  %v302_v41 = vmax.f32 %v300_v39, %v255_v1 }
  0xe2   : > { %305 = vrot.lane.b32.xlu1 %v302_v41, %s898_s25  ;;  %303 = vrot.lane.b32.xlu0 %v301_v40, %s898_s25 }
  0xe6   : > { %314 = vrot.lane.b32.xlu1 %v302_v41, %s899_s26  ;;  %312 = vrot.lane.b32.xlu0 %v301_v40, %s899_s26 }
  0xea   : > { %323 = vrot.lane.b32.xlu1 %v302_v41, %s900_s30  ;;  %321 = vrot.lane.b32.xlu0 %v301_v40, %s900_s30 }
  0xee   : > { %332 = vrot.lane.b32.xlu1 %v302_v41, %s901_s4  ;;  %330 = vrot.lane.b32.xlu0 %v301_v40, %s901_s4 }
 0x154   : > { %v306_v42 = vpop.permute.xlu1 %305  ;;  %v304_v43 = vpop.permute.xlu0 %303 }
 0x155   : > { %v308_v53 = vsel %vm307_vm13, %v304_v43, %v306_v42  ;;  %v309_v54 = vsel %vm307_vm13, %v306_v42, %v304_v43 }
 0x156   : > { %v310_v61 = vsel %vm245_vm14, %v309_v54, -inf  ;;  %v311_v62 = vsel %vm246_vm15, %v308_v53, -inf }
 0x158   : > { %v315_v47 = vpop.permute.xlu1 %314  ;;  %v313_v48 = vpop.permute.xlu0 %312 }
 0x159   : > { %v317_v51 = vsel %vm1464_vm12, %v313_v48, %v315_v47  ;;  %v318_v52 = vsel %vm1464_vm12, %v315_v47, %v313_v48  ;;  %vm1469_vm12 = vcmp.le.s32.totalorder %v1181_v45, 13 }
 0x15a   : > { %v319_v57 = vsel %vm247_vm11, %v318_v52, -inf  ;;  %v320_v58 = vsel %vm248_vm9, %v317_v51, -inf }
 0x15b   : > { %v339_v5 = vmax.f32 %v310_v61, %v319_v57  ;;  %v340_v6 = vmax.f32 %v311_v62, %v320_v58 }
 0x15c   : > { %v324_v49 = vpop.permute.xlu1 %323  ;;  %v322_v50 = vpop.permute.xlu0 %321 }
 0x15d   : > { %v326_v55 = vsel %vm325_vm10, %v322_v50, %v324_v49  ;;  %v327_v56 = vsel %vm325_vm10, %v324_v49, %v322_v50 }
 0x15e   : > { %v328_v1 = vsel %vm249_vm8, %v326_v55, -inf  ;;  %v329_v2 = vsel %vm250_vm5, %v327_v56, -inf }
 0x160   : > { %v333_v59 = vpop.permute.xlu1 %332  ;;  %v331_v60 = vpop.permute.xlu0 %330 }
 0x161   : > { %v335_v63 = vsel %vm334_vm7, %v331_v60, %v333_v59  ;;  %v336_v0 = vsel %vm334_vm7, %v333_v59, %v331_v60 }
 0x162   : > { %v337_v3 = vsel %vm1469_vm12, %v335_v63, -inf  ;;  %v338_v4 = vsel %vm1467_vm6, %v336_v0, -inf  ;;  %vm1488_vm6 = vcmp.ge.s32.totalorder %v1121_v12, 1 }
 0x163   : > { %v341_v7 = vmax.f32 %v328_v1, %v337_v3  ;;  %v342_v8 = vmax.f32 %v329_v2, %v338_v4 }
 0x165   : > { %v343_v10 = vmax.f32 %v339_v5, %v341_v7  ;;  %v344_v13 = vmax.f32 %v340_v6, %v342_v8 }
 0x167   : > { %v345_v14 = vmax.f32 %v343_v10, %v301_v40  ;;  %v346_v15 = vmax.f32 %v344_v13, %v302_v41 }
 0x169   : > { %v349_v16 = vcombine.low %v345_v14, %v346_v15  ;;  %355 = vrot.lane.b32.xlu1 %v346_v15, %s895_s9  ;;  %353 = vrot.lane.b32.xlu0 %v345_v14, %s895_s9 }
 0x16b   : > { %652 = vst [vmem:[%s1093_s8 + $0x8] sm:$0xff] %v349_v16 }
 0x16d   : > { %363 = vrot.lane.b32.xlu1 %v346_v15, %s894_s20  ;;  %361 = vrot.lane.b32.xlu0 %v345_v14, %s894_s20 }
 0x171   : > { %371 = vrot.lane.b32.xlu1 %v346_v15, %s896_s22  ;;  %369 = vrot.lane.b32.xlu0 %v345_v14, %s896_s22 }
 0x175   : > { %379 = vrot.lane.b32.xlu1 %v346_v15, %s897_s29  ;;  %377 = vrot.lane.b32.xlu0 %v345_v14, %s897_s29 }
 0x1db   : > { %v356_v17 = vpop.permute.xlu1 %355  ;;  %v354_v18 = vpop.permute.xlu0 %353 }
 0x1dc   : > { %v357_v25 = vsel %vm1468_vm0, %v354_v18, %v356_v17  ;;  %v358_v26 = vsel %vm1468_vm0, %v356_v17, %v354_v18  ;;  %vm1489_vm0 = vcmp.lt.s32.totalorder %v1113_v9, 126 }
 0x1dd   : > { %v360_v34 = vsel %vm1488_vm6, %v357_v25, -inf  ;;  %vm1490_vm12 = vmmov %vm1489_vm0  ;;  %vm1499_vm6 = vcmp.lt.s32.totalorder %v1113_v9, 2 }
 0x1df   : > { %v364_v19 = vpop.permute.xlu1 %363  ;;  %v362_v20 = vpop.permute.xlu0 %361 }
 0x1e0   : > { %v365_v23 = vsel %vm1466_vm1, %v362_v20, %v364_v19  ;;  %v366_v24 = vsel %vm1466_vm1, %v364_v19, %v362_v20  ;;  %vm1487_vm1 = vcmp.ge.s32.totalorder %v1117_v11, 1 }
 0x1e1   : > { %v367_v29 = vsel %vm1471_vm2, %v366_v24, -inf  ;;  %v368_v30 = vsel %vm1472_vm3, %v365_v23, -inf  ;;  %v359_v33 = vsel %vm1487_vm1, %v358_v26, -inf  ;;  %vm1492_vm2 = vcmp.le.s32.totalorder %v1121_v12, 14 }
 0x1e2   : > { %vm1493_vm3 = vcmp.le.s32.totalorder %v1117_v11, 13  ;;  %vm1494_vm1 = vcmp.le.s32.totalorder %v1121_v12, 13  ;;  %v385_v41 = vmax.f32 %v359_v33, %v367_v29  ;;  %v386_v42 = vmax.f32 %v360_v34, %v368_v30 }
 0x1e3   : > { %v372_v21 = vpop.permute.xlu1 %371  ;;  %v370_v22 = vpop.permute.xlu0 %369 }
 0x1e4   : > { %v373_v27 = vsel %vm1470_vm4, %v370_v22, %v372_v21  ;;  %v374_v28 = vsel %vm1470_vm4, %v372_v21, %v370_v22  ;;  %vm1491_vm4 = vcmp.le.s32.totalorder %v1117_v11, 14 }
 0x1e5   : > { %v375_v37 = vsel %vm1491_vm4, %v373_v27, -inf  ;;  %v376_v38 = vsel %vm1492_vm2, %v374_v28, -inf  ;;  %vm1498_vm4 = vcmp.le.s32.totalorder %v1185_v46, 13 }
 0x1e7   : > { %v380_v31 = vpop.permute.xlu1 %379  ;;  %v378_v32 = vpop.permute.xlu0 %377 }
 0x1e8   : > { %v381_v35 = vsel %vm1489_vm0, %v378_v32, %v380_v31  ;;  %v382_v36 = vsel %vm1490_vm12, %v380_v31, %v378_v32  ;;  %vm1495_vm0 = vcmp.lt.s32.totalorder %v1113_v9, 32  ;;  %vm1500_vm12 = vmmov %vm1499_vm6 }
 0x1e9   : > { %v383_v39 = vsel %vm1493_vm3, %v381_v35, -inf  ;;  %v384_v40 = vsel %vm1494_vm1, %v382_v36, -inf  ;;  %vm1496_vm2 = vmmov %vm1495_vm0  ;;  %vm1497_vm3 = vcmp.le.s32.totalorder %v1181_v45, 13  ;;  %vm1501_vm1 = vcmp.lt.s32.totalorder %v1113_v9, 1 }
 0x1ea   : > { %v387_v43 = vmax.f32 %v375_v37, %v383_v39  ;;  %v388_v44 = vmax.f32 %v376_v38, %v384_v40 }
 0x1ec   : > { %v389_v47 = vmax.f32 %v385_v41, %v387_v43  ;;  %v390_v48 = vmax.f32 %v386_v42, %v388_v44 }
 0x1ee   : > { %v391_v49 = vmax.f32 %v389_v47, %v345_v14  ;;  %v392_v50 = vmax.f32 %v390_v48, %v346_v15 }
 0x1f0   : > { %395 = vrot.lane.b32.xlu1 %v392_v50, %s898_s25  ;;  %393 = vrot.lane.b32.xlu0 %v391_v49, %s898_s25 }
 0x1f4   : > { %403 = vrot.lane.b32.xlu1 %v392_v50, %s899_s26  ;;  %401 = vrot.lane.b32.xlu0 %v391_v49, %s899_s26 }
 0x1f8   : > { %411 = vrot.lane.b32.xlu1 %v392_v50, %s900_s30  ;;  %409 = vrot.lane.b32.xlu0 %v391_v49, %s900_s30 }
 0x1fc   : > { %419 = vrot.lane.b32.xlu1 %v392_v50, %s901_s4  ;;  %417 = vrot.lane.b32.xlu0 %v391_v49, %s901_s4 }
 0x262   : > { %v396_v51 = vpop.permute.xlu1 %395  ;;  %v394_v52 = vpop.permute.xlu0 %393 }
 0x263   : > { %v397_v59 = vsel %vm307_vm13, %v394_v52, %v396_v51  ;;  %v398_v60 = vsel %vm307_vm13, %v396_v51, %v394_v52 }
 0x264   : > { %v399_v3 = vsel %vm245_vm14, %v398_v60, -inf  ;;  %v400_v4 = vsel %vm246_vm15, %v397_v59, -inf }
 0x266   : > { %v404_v53 = vpop.permute.xlu1 %403  ;;  %v402_v54 = vpop.permute.xlu0 %401 }
 0x267   : > { %v405_v57 = vsel %vm1495_vm0, %v402_v54, %v404_v53  ;;  %v406_v58 = vsel %vm1496_vm2, %v404_v53, %v402_v54  ;;  %vm1502_vm0 = vmmov %vm1501_vm1  ;;  %vm1503_vm2 = vcmp.lt.s32.totalorder %v1113_v9, 127 }
 0x268   : > { %v407_v63 = vsel %vm247_vm11, %v406_v58, -inf  ;;  %v408_v0 = vsel %vm248_vm9, %v405_v57, -inf }
 0x269   : > { %v425_v14 = vmax.f32 %v399_v3, %v407_v63  ;;  %v426_v15 = vmax.f32 %v400_v4, %v408_v0 }
 0x26a   : > { %v412_v55 = vpop.permute.xlu1 %411  ;;  %v410_v56 = vpop.permute.xlu0 %409 }
 0x26b   : > { %v413_v61 = vsel %vm325_vm10, %v410_v56, %v412_v55  ;;  %v414_v62 = vsel %vm325_vm10, %v412_v55, %v410_v56 }
 0x26c   : > { %v415_v7 = vsel %vm249_vm8, %v413_v61, -inf  ;;  %v416_v8 = vsel %vm250_vm5, %v414_v62, -inf }
 0x26e   : > { %v420_v1 = vpop.permute.xlu1 %419  ;;  %v418_v2 = vpop.permute.xlu0 %417 }
 0x26f   : > { %v421_v5 = vsel %vm334_vm7, %v418_v2, %v420_v1  ;;  %v422_v6 = vsel %vm334_vm7, %v420_v1, %v418_v2 }
 0x270   : > { %v423_v10 = vsel %vm1497_vm3, %v421_v5, -inf  ;;  %v424_v13 = vsel %vm1498_vm4, %v422_v6, -inf  ;;  %vm1504_vm3 = vmmov %vm1503_vm2  ;;  %vm1505_vm4 = vcmp.ge.s32.totalorder %v1117_v11, 2 }
 0x271   : > { %v427_v16 = vmax.f32 %v415_v7, %v423_v10  ;;  %v428_v17 = vmax.f32 %v416_v8, %v424_v13 }
 0x273   : > { %v429_v18 = vmax.f32 %v425_v14, %v427_v16  ;;  %v430_v19 = vmax.f32 %v426_v15, %v428_v17 }
 0x275   : > { %v431_v20 = vmax.f32 %v429_v18, %v391_v49  ;;  %v432_v21 = vmax.f32 %v430_v19, %v392_v50 }
 0x277   : > { %v435_v22 = vcombine.low %v431_v20, %v432_v21  ;;  %441 = vrot.lane.b32.xlu1 %v432_v21, %s895_s9  ;;  %439 = vrot.lane.b32.xlu0 %v431_v20, %s895_s9  ;;  %s804_s9 = scalar_lea.vmem %s1400_s18, 512 }
 0x278   : > { %p805_p11 = scmp.ne.s32.totalorder %s1400_s18, %s804_s9 }
 0x279   : > { %653 = vst [vmem:[%s1093_s8 + $0x10] sm:$0xff] %v435_v22 }
 0x27a   : > { %p806_p6 = pnand %p805_p11, %p1026_p13 }
 0x27b   : > { %449 = vrot.lane.b32.xlu1 %v432_v21, %s894_s20  ;;  %447 = vrot.lane.b32.xlu0 %v431_v20, %s894_s20  ;;  %s526_s20 = scalar_lea.sflag [#allocation4], %s1080_s11 }
 0x27c   : > { %p807_p8 = pneg %p806_p6 }
 0x27f   : > { %457 = vrot.lane.b32.xlu1 %v432_v21, %s896_s22  ;;  %455 = vrot.lane.b32.xlu0 %v431_v20, %s896_s22  ;;  %s808_s22 = sshll.u32 %s902_s15, 4  ;;  %s809_s22 = int_to_ptr.vmem [resolvable:$false] %s808_s22 }
 0x280   : > { %p811_p9 = scmp.lt.s32.totalorder %s1400_s18, %s809_s22 }
 0x283   : > { %465 = vrot.lane.b32.xlu1 %v432_v21, %s897_s29  ;;  %463 = vrot.lane.b32.xlu0 %v431_v20, %s897_s29  ;;  %s810_s29 = scalar_lea.vmem %s809_s22, 1024 }
 0x284   : > { %p812_p12 = scmp.lt.s32.totalorder %s810_s29, %s804_s9 }
 0x286   : > { %p813_p0 = por %p812_p12, %p811_p9 }
 0x288   : > { %p814_p5 = pnand %p813_p0, %p807_p8 }
 0x2e9   : > { %v442_v23 = vpop.permute.xlu1 %441  ;;  %v440_v24 = vpop.permute.xlu0 %439 }
 0x2ea   : > { %v443_v31 = vsel %vm1501_vm1, %v440_v24, %v442_v23  ;;  %v444_v32 = vsel %vm1502_vm0, %v442_v23, %v440_v24  ;;  %vm1508_vm1 = vcmp.ge.s32.totalorder %v1121_v12, 1  ;;  %vm1509_vm0 = vcmp.lt.s32.totalorder %v1113_v9, 126 }
 0x2eb   : > { %v446_v40 = vsel %vm1508_vm1, %v443_v31, -inf  ;;  %vm1515_vm1 = vcmp.lt.s32.totalorder %v1113_v9, 32 }
 0x2ed   : > { %v450_v25 = vpop.permute.xlu1 %449  ;;  %v448_v26 = vpop.permute.xlu0 %447 }
 0x2ee   : > { %v451_v29 = vsel %vm1499_vm6, %v448_v26, %v450_v25  ;;  %v452_v30 = vsel %vm1500_vm12, %v450_v25, %v448_v26  ;;  %vm1506_vm6 = vcmp.ge.s32.totalorder %v1121_v12, 2  ;;  %vm1507_vm12 = vcmp.ge.s32.totalorder %v1117_v11, 1 }
 0x2ef   : > { %v453_v35 = vsel %vm1505_vm4, %v452_v30, -inf  ;;  %v454_v36 = vsel %vm1506_vm6, %v451_v29, -inf  ;;  %v445_v39 = vsel %vm1507_vm12, %v444_v32, -inf  ;;  %vm1512_vm4 = vcmp.le.s32.totalorder %v1121_v12, 14 }
 0x2f0   : > { %vm1513_vm6 = vcmp.le.s32.totalorder %v1117_v11, 13  ;;  %vm1514_vm12 = vcmp.le.s32.totalorder %v1121_v12, 13  ;;  %v471_v49 = vmax.f32 %v445_v39, %v453_v35  ;;  %v472_v50 = vmax.f32 %v446_v40, %v454_v36 }
 0x2f1   : > { %v458_v27 = vpop.permute.xlu1 %457  ;;  %v456_v28 = vpop.permute.xlu0 %455 }
 0x2f2   : > { %v459_v33 = vsel %vm1503_vm2, %v456_v28, %v458_v27  ;;  %v460_v34 = vsel %vm1504_vm3, %v458_v27, %v456_v28  ;;  %vm1510_vm2 = vmmov %vm1509_vm0  ;;  %vm1511_vm3 = vcmp.le.s32.totalorder %v1117_v11, 14 }
 0x2f3   : > { %v461_v43 = vsel %vm1511_vm3, %v459_v33, -inf  ;;  %v462_v44 = vsel %vm1512_vm4, %v460_v34, -inf }
 0x2f5   : > { %v466_v37 = vpop.permute.xlu1 %465  ;;  %v464_v38 = vpop.permute.xlu0 %463 }
 0x2f6   : > { %v467_v41 = vsel %vm1509_vm0, %v464_v38, %v466_v37  ;;  %v468_v42 = vsel %vm1510_vm2, %v466_v37, %v464_v38  ;;  %vm1516_vm0 = vmmov %vm1515_vm1 }
 0x2f7   : > { %v469_v47 = vsel %vm1513_vm6, %v467_v41, -inf  ;;  %v470_v48 = vsel %vm1514_vm12, %v468_v42, -inf }
 0x2f8   : > { %v473_v51 = vmax.f32 %v461_v43, %v469_v47  ;;  %v474_v52 = vmax.f32 %v462_v44, %v470_v48 }
 0x2fa   : > { %v475_v53 = vmax.f32 %v471_v49, %v473_v51  ;;  %v476_v54 = vmax.f32 %v472_v50, %v474_v52 }
 0x2fc   : > { %v477_v55 = vmax.f32 %v475_v53, %v431_v20  ;;  %v478_v56 = vmax.f32 %v476_v54, %v432_v21 }
 0x2fe   : > { %481 = vrot.lane.b32.xlu1 %v478_v56, %s898_s25  ;;  %479 = vrot.lane.b32.xlu0 %v477_v55, %s898_s25 }
 0x302   : > { %489 = vrot.lane.b32.xlu1 %v478_v56, %s899_s26  ;;  %487 = vrot.lane.b32.xlu0 %v477_v55, %s899_s26 }
 0x306   : > { %497 = vrot.lane.b32.xlu1 %v478_v56, %s900_s30  ;;  %495 = vrot.lane.b32.xlu0 %v477_v55, %s900_s30 }
 0x30a   : > { %505 = vrot.lane.b32.xlu1 %v478_v56, %s901_s4  ;;  %503 = vrot.lane.b32.xlu0 %v477_v55, %s901_s4 }
 0x370   : > { %v482_v11 = vpop.permute.xlu1 %481  ;;  %v480_v12 = vpop.permute.xlu0 %479 }
 0x371   : > { %v483_v63 = vsel %vm307_vm13, %v480_v12, %v482_v11  ;;  %v484_v0 = vsel %vm307_vm13, %v482_v11, %v480_v12 }
 0x372   : > { %v485_v7 = vsel %vm245_vm14, %v484_v0, -inf  ;;  %v486_v8 = vsel %vm246_vm15, %v483_v63, -inf }
 0x374   : > { %v490_v57 = vpop.permute.xlu1 %489  ;;  %v488_v58 = vpop.permute.xlu0 %487 }
 0x375   : > { %v491_v61 = vsel %vm1515_vm1, %v488_v58, %v490_v57  ;;  %v492_v62 = vsel %vm1516_vm0, %v490_v57, %v488_v58 }
 0x376   : > { %v493_v3 = vsel %vm247_vm11, %v492_v62, -inf  ;;  %v494_v4 = vsel %vm248_vm9, %v491_v61, -inf  ;;  %vm1517_vm9 = vcmp.le.s32.totalorder %v1181_v45, 13 }
 0x377   : > { %v511_v18 = vmax.f32 %v485_v7, %v493_v3  ;;  %v512_v19 = vmax.f32 %v486_v8, %v494_v4 }
 0x378   : > { %v498_v59 = vpop.permute.xlu1 %497  ;;  %v496_v60 = vpop.permute.xlu0 %495 }
 0x379   : > { %v499_v1 = vsel %vm325_vm10, %v496_v60, %v498_v59  ;;  %v500_v2 = vsel %vm325_vm10, %v498_v59, %v496_v60  ;;  %vm1518_vm10 = vcmp.le.s32.totalorder %v1185_v46, 13 }
 0x37a   : > { %v501_v14 = vsel %vm249_vm8, %v499_v1, -inf  ;;  %v502_v15 = vsel %vm250_vm5, %v500_v2, -inf }
 0x37c   : > { %v506_v5 = vpop.permute.xlu1 %505  ;;  %v504_v6 = vpop.permute.xlu0 %503 }
 0x37d   : > { %v507_v10 = vsel %vm334_vm7, %v504_v6, %v506_v5  ;;  %v508_v13 = vsel %vm334_vm7, %v506_v5, %v504_v6 }
 0x37e   : > { %v509_v16 = vsel %vm1517_vm9, %v507_v10, -inf  ;;  %v510_v17 = vsel %vm1518_vm10, %v508_v13, -inf }
 0x37f   : > { %v513_v20 = vmax.f32 %v501_v14, %v509_v16  ;;  %v514_v9 = vmax.f32 %v502_v15, %v510_v17 }
 0x381   : > { %v515_v21 = vmax.f32 %v511_v18, %v513_v20  ;;  %v516_v22 = vmax.f32 %v512_v19, %v514_v9 }
 0x383   : > { %v517_v23 = vmax.f32 %v515_v21, %v477_v55  ;;  %v518_v24 = vmax.f32 %v516_v22, %v478_v56 }
 0x385   : > { %v521_v45 = vcombine.low %v517_v23, %v518_v24 }
 0x387   : > { %654 = vst [vmem:[%s1093_s8 + $0x18] sm:$0xff] %v521_v45 }
 0x388   : > { %817 = shalt.err (!%p814_p5)
}
 0x389   : > { %s818_s8 = scalar_lea.hbm %s1398_s24, 512  ;;  %s822_s30 = scalar_lea.hbm %s1453_s3, 1024 }
 0x38a   : > { %p819_p10 = scmp.ne.s32.totalorder %s1398_s24, %s818_s8  ;;  %p823_p7 = scmp.lt.u32.totalorder %s1398_s24, %s1453_s3 }
 0x38b   : > { %p824_p3 = scmp.lt.u32.totalorder %s822_s30, %s818_s8  ;;  %p826_p11 = scmp.lt.u32.totalorder %s818_s8, %s1398_s24 }
 0x38c   : > { %p820_p1 = pnand %p819_p10, %p1026_p13 }
 0x38d   : > { %p825_p4 = por %p824_p3, %p823_p7 }
 0x38e   : > { %p821_p2 = pneg %p820_p1 }
 0x38f   : > { %p827_p6 = por %p826_p11, %p825_p4 }
 0x391   : > { %p828_p8 = pnand %p827_p6, %p821_p2 }
 0x393   : > { %831 = shalt.err (!%p828_p8)
}
 0x394   : > { %s903_s7 = smov 128   ;;  %s904_s21 = smov 8  }
 0x395   : > { %668 = dma.vmem_to_hbm [thread:$0]  (%p1026_p13), %s1400_s18, 512, %s1398_s24, %s526_s20, %s903_s7, %s903_s7, %s904_s21  }
 0x396 PF: > { %s556_s10 = sand.u32 1, %s870_s12   ;;  %p1519_p9 = scmp.ne.s32.totalorder %s1476_s23, 0 }
 0x397   : > { %p1520_p12 = scmp.ge.s32.totalorder %s890_s17, 2  ;;  %s557_s19 = scalar_lea.sflag [#allocation4], %s556_s10 }
 0x399   : > { %p679_p0 = pnand %p1520_p12, %p1519_p9 }
 0x39b   : > { %865 = dma.done.wait (!%p679_p0), %s557_s19, 512  }
 0x39c   : > { %867 = vsyncadd (!%p679_p0), %s557_s19, 4294966784  ;;  %s20_s17 = sadd.s32 1, %s890_s17   ;;  %s1521_s12 = smov %s874_s13 }
 0x39d   : > { %p17_p5 = scmp.ge.s32.totalorder %s20_s17, 4   ;;  %s1522_s13 = smov %s878_s14 }
 0x39e   : > { %s1523_s14 = smov %s1034_s5  ;;  %s1524_s15 = smov %s886_s16 }
 0x39f   : > { %s1525_s16 = smov %s1527_s28  ;;  %19 = sbr.rel (!%p17_p5) target bundleno = 7 (0x7), region = 85 }
 0x3a6   :  { %562 = vsyncpa [#allocation3], 1 }
 0x3a7   :  { %564 = vsyncpa [#allocation3 + $0x1], 1 }
 0x3a8   :  { %565 = vsyncpa [#allocation6], 1 }
 0x3a9   :  { %567 = vsyncpa [#allocation6 + $0x1], 1 }
 0x3aa   :  { %568 = vsyncpa [#allocation4], 1 }
 0x3ab   :  { %570 = vsyncpa [#allocation4 + $0x1], 1 }

</bundles_post_ra>
